<compile_context>
chip_gen: v6e
topology: v6e:2x2x1
jax: 0.10.0
libtpu: 0.0.40
codegen_flags: <defaults>
</compile_context>

<pallas_src>
import functools

import jax
import jax.numpy as jnp
from jax.experimental import pallas as pl
from jax.experimental.pallas import tpu as pltpu


def _vmem_capacity_bytes():
    """Physical VMEM of the local TPU, with a conservative (v7x) fallback."""
    try:
        info = pltpu.get_tpu_info()
        for name in ("vmem_capacity_bytes", "vmem_size_bytes", "vmem_bytes"):
            v = getattr(info, name, None)
            if v:
                return int(v)
    except Exception:
        pass
    return 64 << 20  # v7x physical VMEM (v5e / v6e have 128 MiB)


def _choose_tiling(B, bytes_per_col, vmem_budget):
    """Pick (tile_b, B_pad).

    Small B -> one full-array tile (no padding).  Large B -> 128-aligned lane
    tiles of near-equal size, so padding waste is < 128 rows per tile, with at
    least two grid steps so both v7x TensorCores are used.
    """
    if B <= 1024:
        return B, B                                   # single tile == full array
    max_tile = max(128, int(vmem_budget) // int(bytes_per_col))
    max_tile = min((max_tile // 128) * 128, 4096)     # cap: vreg-pressure / spill sanity
    b128 = int(pl.cdiv(B, 128))                       # batch in 128-lane units
    n_tiles = max(2, int(pl.cdiv(b128 * 128, max_tile)))
    tile_b = int(pl.cdiv(b128, n_tiles)) * 128
    n_tiles = int(pl.cdiv(b128 * 128, tile_b))
    return tile_b, n_tiles * tile_b


def _make_mlp_kernel(num_linears, in_f, last_as_reduce):
    """Kernel for `num_linears` Linear layers (ReLU between all but the last)."""

    def kernel(*refs):
        xcat_ref = refs[0]
        out_ref = refs[-1]
        wb = refs[1:-1]                          # alternating (W, b) pairs
        assert len(wb) == 2 * num_linears

        xcat = xcat_ref[...]                     # (2*in_f, tile_b) bf16
        # upcast before the elementwise product (v5e VPU has no bf16)
        x = xcat[:in_f].astype(jnp.float32) * xcat[in_f:].astype(jnp.float32)

        n_matmul = num_linears - 1 if last_as_reduce else num_linears
        for l in range(n_matmul):
            w_ref, b_ref = wb[2 * l], wb[2 * l + 1]
            # bf16 x bf16 -> f32 accumulate on the MXU; transposed layout keeps
            # the batch on the lane axis: result is (out_f, tile_b).
            x = jnp.dot(w_ref[...], x.astype(jnp.bfloat16),
                        preferred_element_type=jnp.float32)
            x = x + b_ref[...]                   # (out_f, 1) broadcasts over lanes
            if l < num_linears - 1:
                x = jnp.maximum(x, 0.0)          # ReLU
                # TODO(synk): F.dropout is identity in eval mode (training=False);
                # a training-mode kernel would draw pltpu.prng_random_bits here.

        if last_as_reduce:
            # out_channels == 1: replace the degenerate N=1 MXU matmul with a
            # VPU multiply + sublane reduction (VPU/XLU slots are idle here).
            w_ref, b_ref = wb[-2], wb[-1]
            w_col = w_ref[...].astype(jnp.float32)                 # (hidden, 1)
            x = jnp.sum(x * w_col, axis=0, keepdims=True) + b_ref[...]

        out_ref[...] = jax.nn.sigmoid(x).astype(out_ref.dtype)      # lane-dense store

    return kernel


@functools.partial(jax.jit, static_argnames=("tile_b",))
def mlp_link_predictor(x_i, x_j, weights, biases, *, tile_b=None):
    """Pallas-backed forward pass of MLPLinkPredictor (eval mode).

    Args:
      x_i, x_j: (B, in_channels) arrays.
      weights:  list of PyTorch-layout (out_f, in_f) weight matrices.
      biases:   list of (out_f,) bias vectors.
    Returns:
      (B, out_channels) float32 sigmoid scores.
    """
    B, in_f = x_i.shape
    num_linears = len(weights)
    out_f = int(weights[-1].shape[0])
    last_as_reduce = (out_f == 1)
    max_width = max([in_f] + [int(w.shape[0]) for w in weights])

    # ---- operands: one lane-major bf16 slab for both embeddings, bf16 weights.
    # Under jit the transpose + concat + cast fuse into a single XLA pass.
    xcat = jnp.concatenate(
        [jnp.asarray(x_i).T, jnp.asarray(x_j).T], axis=0).astype(jnp.bfloat16)

    wb_inputs = []
    for l, (w, b) in enumerate(zip(weights, biases)):
        if last_as_reduce and l == num_linears - 1:
            wb_inputs.append(jnp.asarray(w, jnp.float32).reshape(-1, 1)
                             .astype(jnp.bfloat16))                 # (hidden, 1)
            wb_inputs.append(jnp.asarray(b, jnp.float32).reshape(1, 1))
        else:
            wb_inputs.append(jnp.asarray(w, jnp.bfloat16))           # (out_f, in_f)
            wb_inputs.append(jnp.asarray(b, jnp.float32).reshape(-1, 1))

    # ---- per-generation VMEM sizing (v7x: 64 MiB physical, v5e/v6e: 128 MiB).
    wb_bytes = sum(int(a.size) * a.dtype.itemsize for a in wb_inputs)
    vmem_cap = _vmem_capacity_bytes()
    vmem_limit = int(min(vmem_cap * 3 // 4, 96 << 20))
    tile_budget = max(8 << 20, vmem_limit - 2 * wb_bytes - (4 << 20))

    bytes_per_col = (
        2 * (2 * in_f) * 2                      # double-buffered bf16 input block
        + 2 * out_f * 4                         # double-buffered f32 output block
        + 4 * (in_f + 2 * max_width) * 4        # bound on live f32 activations / spills
    )

    if tile_b is None:
        tile_b, B_pad = _choose_tiling(B, bytes_per_col, tile_budget)
    else:
        assert tile_b == B or tile_b % 128 == 0, \
            "tile_b must equal B or be a multiple of 128 (lane axis)"
        B_pad = int(pl.cdiv(B, tile_b)) * tile_b

    if B_pad != B:
        xcat = jnp.pad(xcat, ((0, 0), (0, B_pad - B)))   # pad lanes, slice off after

    grid = (B_pad // tile_b,)

    in_specs = [pl.BlockSpec((2 * in_f, tile_b), lambda i: (0, i))]
    for a in wb_inputs:
        # Weights/biases are small and their block index is constant across the
        # grid, so Pallas only DMAs them once; their (double-buffered) footprint
        # is already subtracted from `tile_budget` above.
        in_specs.append(pl.BlockSpec(tuple(a.shape), lambda i: (0, 0)))
    out_spec = pl.BlockSpec((out_f, tile_b), lambda i: (0, i))

    flops = B_pad * (in_f + 2 * sum(int(w.size) for w in weights))
    bytes_accessed = int(xcat.size) * 2 + wb_bytes + B_pad * out_f * 4
    cost = pl.CostEstimate(flops=flops, transcendentals=B_pad * out_f,
                           bytes_accessed=bytes_accessed)

    kernel = _make_mlp_kernel(num_linears, in_f, last_as_reduce)

    out_t = pl.pallas_call(
        kernel,
        out_shape=jax.ShapeDtypeStruct((out_f, B_pad), jnp.float32),
        grid_spec=pltpu.PrefetchScalarGridSpec(
            num_scalar_prefetch=0,
            grid=grid,
            in_specs=in_specs,
            out_specs=out_spec,
        ),
        compiler_params=pltpu.CompilerParams(
            dimension_semantics=("parallel",),
            vmem_limit_bytes=vmem_limit,
        ),
        cost_estimate=cost,
    )(xcat, *wb_inputs)

    return out_t[:, :B].T                         # back to (B, out_channels)


def init_params(key, in_channels, hidden_channels, out_channels, num_layers):
    """Deterministic init matching torch.nn.Linear default (uniform +/- 1/sqrt(fan_in)).

    Weights are stored in native PyTorch layout (out_f, in_f).
    """
    dims = [in_channels] + [hidden_channels] * (num_layers - 1) + [out_channels]
    weights, biases = [], []
    for l in range(num_layers):
        fan_in, fan_out = dims[l], dims[l + 1]
        key, kw, kb = jax.random.split(key, 3)
        bound = 1.0 / jnp.sqrt(jnp.float32(fan_in))
        weights.append(jax.random.uniform(
            kw, (fan_out, fan_in), jnp.float32, minval=-bound, maxval=bound))
        biases.append(jax.random.uniform(
            kb, (fan_out,), jnp.float32, minval=-bound, maxval=bound))
    return weights, biases


def reference_forward(x_i, x_j, weights, biases):
    """f32 reference on the same bf16-rounded inputs/weights the kernel consumes."""
    f32 = jnp.float32
    xi = x_i.astype(jnp.bfloat16).astype(f32)
    xj = x_j.astype(jnp.bfloat16).astype(f32)
    x = xi * xj
    for l, (w, b) in enumerate(zip(weights, biases)):
        w32 = w.astype(jnp.bfloat16).astype(f32)
        x = x @ w32.T + b
        if l < len(weights) - 1:
            x = jnp.maximum(x, 0.0)
    return jax.nn.sigmoid(x)


if __name__ == "__main__":
    # num_layers=3 -> Linear(in, h), Linear(h, h), Linear(h, out)
    in_channels = 32
    hidden_channels = 32
    out_channels = 1
    num_layers = 3
    dropout = 0.5          # unused: eval mode => F.dropout is identity

    key = jax.random.PRNGKey(0)
    key, k_params = jax.random.split(key)
    weights, biases = init_params(k_params, in_channels, hidden_channels,
                                  out_channels, num_layers)

    # Three cases: tiny single-tile batch, a non-128-multiple single-tile batch,
    # and a larger batch that exercises the padded multi-tile (128-aligned,
    # lane-dense, megacore-parallel) path.
    for B in (16, 300, 2500):
        key, k_i, k_j = jax.random.split(key, 3)
        x_i = jax.random.normal(k_i, (B, in_channels), jnp.float32)
        x_j = jax.random.normal(k_j, (B, in_channels), jnp.float32)

        out = jax.block_until_ready(mlp_link_predictor(x_i, x_j, weights, biases))
        ref = reference_forward(x_i, x_j, weights, biases)

        assert out.shape == (B, out_channels), out.shape
        # bf16 weight/input/activation storage => compare against the
        # bf16-rounded reference with a matching tolerance.
        assert jnp.allclose(out, ref, atol=1e-2, rtol=1e-2), \
            float(jnp.max(jnp.abs(out - ref)))

    print("KERNEL_OK")
</pallas_src>

<mosaic_0001>
module attributes {stable_mosaic.version = 11 : i64} {
  func.func @kernel(%arg0: i32, %arg1: memref<64x16xbf16, #tpu.memory_space<vmem>>, %arg2: memref<32x32xbf16, #tpu.memory_space<vmem>>, %arg3: memref<32x1xf32, #tpu.memory_space<vmem>>, %arg4: memref<32x32xbf16, #tpu.memory_space<vmem>>, %arg5: memref<32x1xf32, #tpu.memory_space<vmem>>, %arg6: memref<32x1xbf16, #tpu.memory_space<vmem>>, %arg7: memref<1x1xf32, #tpu.memory_space<vmem>>, %arg8: memref<1x16xf32, #tpu.memory_space<vmem>>) attributes {dimension_semantics = [#tpu.dimension_semantics<parallel>], iteration_bounds = array<i64: 1>, scalar_prefetch = 0 : i64, scratch_operands = 0 : i64, tpu.core_type = #tpu.core_type<tc>, window_params = [{transform_indices = @transform_0, window_bounds = array<i64: 64, 16>}, {pipeline_mode = #tpu.pipeline_mode<synchronous>, transform_indices = @transform_1, window_bounds = array<i64: 32, 32>}, {pipeline_mode = #tpu.pipeline_mode<synchronous>, transform_indices = @transform_2, window_bounds = array<i64: 32, 1>}, {pipeline_mode = #tpu.pipeline_mode<synchronous>, transform_indices = @transform_3, window_bounds = array<i64: 32, 32>}, {pipeline_mode = #tpu.pipeline_mode<synchronous>, transform_indices = @transform_4, window_bounds = array<i64: 32, 1>}, {pipeline_mode = #tpu.pipeline_mode<synchronous>, transform_indices = @transform_5, window_bounds = array<i64: 32, 1>}, {pipeline_mode = #tpu.pipeline_mode<synchronous>, transform_indices = @transform_6, window_bounds = array<i64: 1, 1>}, {transform_indices = @transform_7, window_bounds = array<i64: 1, 16>}]} {
    %c0 = arith.constant 0 : index
    %c0_0 = arith.constant 0 : index
    %0 = vector.load %arg1[%c0, %c0_0] : memref<64x16xbf16, #tpu.memory_space<vmem>>, vector<64x16xbf16>
    %1 = vector.extract_strided_slice %0 {offsets = [0, 0], sizes = [32, 16], strides = [1, 1]} : vector<64x16xbf16> to vector<32x16xbf16>
    %2 = arith.extf %1 : vector<32x16xbf16> to vector<32x16xf32>
    %3 = vector.extract_strided_slice %0 {offsets = [32, 0], sizes = [32, 16], strides = [1, 1]} : vector<64x16xbf16> to vector<32x16xbf16>
    %4 = arith.extf %3 : vector<32x16xbf16> to vector<32x16xf32>
    %5 = arith.mulf %2, %4 : vector<32x16xf32>
    %c0_1 = arith.constant 0 : index
    %c0_2 = arith.constant 0 : index
    %6 = vector.load %arg2[%c0_1, %c0_2] : memref<32x32xbf16, #tpu.memory_space<vmem>>, vector<32x32xbf16>
    %7 = arith.truncf %5 : vector<32x16xf32> to vector<32x16xbf16>
    %cst = arith.constant dense<0.000000e+00> : vector<32x16xf32>
    %8 = tpu.matmul %6, %7, %cst {dimension_numbers = #tpu.dot_dimension_numbers<[1], [0], [0], [1], [0, 0, 1, 1], [], []>} : vector<32x32xbf16>, vector<32x16xbf16>, vector<32x16xf32> -> vector<32x16xf32>
    %c0_3 = arith.constant 0 : index
    %c0_4 = arith.constant 0 : index
    %9 = vector.load %arg3[%c0_3, %c0_4] : memref<32x1xf32, #tpu.memory_space<vmem>>, vector<32x1xf32>
    %10 = vector.broadcast %9 : vector<32x1xf32> to vector<32x16xf32>
    %11 = arith.addf %8, %10 : vector<32x16xf32>
    %cst_5 = arith.constant 0.000000e+00 : f32
    %12 = vector.broadcast %cst_5 : f32 to vector<32x16xf32>
    %13 = arith.maximumf %11, %12 : vector<32x16xf32>
    %c0_6 = arith.constant 0 : index
    %c0_7 = arith.constant 0 : index
    %14 = vector.load %arg4[%c0_6, %c0_7] : memref<32x32xbf16, #tpu.memory_space<vmem>>, vector<32x32xbf16>
    %15 = arith.truncf %13 : vector<32x16xf32> to vector<32x16xbf16>
    %cst_8 = arith.constant dense<0.000000e+00> : vector<32x16xf32>
    %16 = tpu.matmul %14, %15, %cst_8 {dimension_numbers = #tpu.dot_dimension_numbers<[1], [0], [0], [1], [0, 0, 1, 1], [], []>} : vector<32x32xbf16>, vector<32x16xbf16>, vector<32x16xf32> -> vector<32x16xf32>
    %c0_9 = arith.constant 0 : index
    %c0_10 = arith.constant 0 : index
    %17 = vector.load %arg5[%c0_9, %c0_10] : memref<32x1xf32, #tpu.memory_space<vmem>>, vector<32x1xf32>
    %18 = vector.broadcast %17 : vector<32x1xf32> to vector<32x16xf32>
    %19 = arith.addf %16, %18 : vector<32x16xf32>
    %cst_11 = arith.constant 0.000000e+00 : f32
    %20 = vector.broadcast %cst_11 : f32 to vector<32x16xf32>
    %21 = arith.maximumf %19, %20 : vector<32x16xf32>
    %c0_12 = arith.constant 0 : index
    %c0_13 = arith.constant 0 : index
    %22 = vector.load %arg6[%c0_12, %c0_13] : memref<32x1xbf16, #tpu.memory_space<vmem>>, vector<32x1xbf16>
    %23 = arith.extf %22 : vector<32x1xbf16> to vector<32x1xf32>
    %24 = vector.broadcast %23 : vector<32x1xf32> to vector<32x16xf32>
    %25 = arith.mulf %21, %24 : vector<32x16xf32>
    %cst_14 = arith.constant dense<0.000000e+00> : vector<16xf32>
    %26 = vector.multi_reduction <add>, %25, %cst_14 [0] : vector<32x16xf32> to vector<16xf32>
    %27 = vector.shape_cast %26 : vector<16xf32> to vector<1x16xf32>
    %c0_15 = arith.constant 0 : index
    %c0_16 = arith.constant 0 : index
    %28 = vector.load %arg7[%c0_15, %c0_16] : memref<1x1xf32, #tpu.memory_space<vmem>>, vector<1x1xf32>
    %29 = vector.broadcast %28 : vector<1x1xf32> to vector<1x16xf32>
    %30 = arith.addf %27, %29 : vector<1x16xf32>
    %31 = arith.negf %30 : vector<1x16xf32>
    %32 = math.exp %31 : vector<1x16xf32>
    %cst_17 = arith.constant 1.000000e+00 : f32
    %33 = vector.broadcast %cst_17 : f32 to vector<1x16xf32>
    %34 = arith.addf %33, %32 : vector<1x16xf32>
    %35 = arith.divf %33, %34 : vector<1x16xf32>
    %c0_18 = arith.constant 0 : index
    %c0_19 = arith.constant 0 : index
    %36 = vector.load %arg8[%c0_18, %c0_19] : memref<1x16xf32, #tpu.memory_space<vmem>>, vector<1x16xf32>
    tpu.vector_store %arg8[%c0_18, %c0_19], %35 {strides = array<i32>} : memref<1x16xf32, #tpu.memory_space<vmem>>, vector<1x16xf32>,
    return
  }
  func.func @transform_0(%arg0: i32) -> (i32, i32) {
    %c0_i32 = arith.constant 0 : i32
    %c0_i32_0 = arith.constant 0 : i32
    return %c0_i32, %arg0 : i32, i32
  }
  func.func @transform_1(%arg0: i32) -> (i32, i32) {
    %c0_i32 = arith.constant 0 : i32
    %c0_i32_0 = arith.constant 0 : i32
    %c0_i32_1 = arith.constant 0 : i32
    return %c0_i32, %c0_i32_0 : i32, i32
  }
  func.func @transform_2(%arg0: i32) -> (i32, i32) {
    %c0_i32 = arith.constant 0 : i32
    %c0_i32_0 = arith.constant 0 : i32
    %c0_i32_1 = arith.constant 0 : i32
    return %c0_i32, %c0_i32_0 : i32, i32
  }
  func.func @transform_3(%arg0: i32) -> (i32, i32) {
    %c0_i32 = arith.constant 0 : i32
    %c0_i32_0 = arith.constant 0 : i32
    %c0_i32_1 = arith.constant 0 : i32
    return %c0_i32, %c0_i32_0 : i32, i32
  }
  func.func @transform_4(%arg0: i32) -> (i32, i32) {
    %c0_i32 = arith.constant 0 : i32
    %c0_i32_0 = arith.constant 0 : i32
    %c0_i32_1 = arith.constant 0 : i32
    return %c0_i32, %c0_i32_0 : i32, i32
  }
  func.func @transform_5(%arg0: i32) -> (i32, i32) {
    %c0_i32 = arith.constant 0 : i32
    %c0_i32_0 = arith.constant 0 : i32
    %c0_i32_1 = arith.constant 0 : i32
    return %c0_i32, %c0_i32_0 : i32, i32
  }
  func.func @transform_6(%arg0: i32) -> (i32, i32) {
    %c0_i32 = arith.constant 0 : i32
    %c0_i32_0 = arith.constant 0 : i32
    %c0_i32_1 = arith.constant 0 : i32
    return %c0_i32, %c0_i32_0 : i32, i32
  }
  func.func @transform_7(%arg0: i32) -> (i32, i32) {
    %c0_i32 = arith.constant 0 : i32
    %c0_i32_0 = arith.constant 0 : i32
    return %c0_i32, %arg0 : i32, i32
  }
}

</mosaic_0001>

<bundles_post_ra>
// kernel: mlp_link_predictor.1
= control target key start
LH: loop header
LB: loop body
LE: loop exit
PB: predicated region body
PF: predicated region fallthrough
CT: control target
= control target key end

     0   :  { %s534_s0 = inlined_call_operand.vmem [shape: bf16[64,16], index: 0, kind: input, shape index: {}]   ;;  %s535_s1 = inlined_call_operand.vmem [shape: bf16[32,32], index: 1, kind: input, shape index: {}]   ;;  %s536_s2 = inlined_call_operand.vmem [shape: f32[32,1], index: 2, kind: input, shape index: {}]   ;;  %s537_s3 = inlined_call_operand.vmem [shape: bf16[32,32], index: 3, kind: input, shape index: {}]   ;;  %s538_s4 = inlined_call_operand.vmem [shape: f32[32,1], index: 4, kind: input, shape index: {}]   ;;  %s539_s5 = inlined_call_operand.vmem [shape: bf16[32,1], index: 5, kind: input, shape index: {}]   ;;  %s540_s6 = inlined_call_operand.<no memory space> [shape: f32[1,1], index: 6, kind: input, shape index: {}]   ;;  %s541_s7 = inlined_call_operand.hbm [shape: f32[1,16], index: 7, kind: output, shape index: {}]  }
   0x1   :  { %v12_v0 = vstv %s540_s6 }
   0x2   :  { %13 = vst [vmem:[#allocation2] sm:$0x1] %v12_v0 }
   0x3   :  { %v361_v1 = vld [vmem:[%s534_s0 + $0x8] sm:$0xff]   ;;  %v363_v2 = vld [vmem:[%s534_s0 + $0x18] sm:$0xff]   ;;  %v338_v3 = vld [vmem:[%s534_s0] sm:$0xff]   ;;  %vm90_vm0 = vcmask 261120   ;;  %v428_v9 = vmov 0  }
   0x4   :  { %v343_v4 = vunpack.c.l.bf16 %v361_v1  ;;  %v344_v5 = vunpack.c.h.bf16 %v361_v1  ;;  %v351_v6 = vunpack.c.l.bf16 %v363_v2  ;;  %v352_v7 = vunpack.c.h.bf16 %v363_v2  ;;  %v362_v8 = vld [vmem:[%s534_s0 + $0x10] sm:$0xff]   ;;  %391 = vset.pattern.permute.xlu0 %v428_v9  ;;  %392 = vset.pattern.permute.xlu1 %v428_v9  ;;  %v398_v14 = vld [vmem:[%s535_s1] sm:$0xff]   ;;  %v59_v22 = vld [vmem:[%s536_s2 + $0x18] sm:$0xff] }
   0x5   :  { %v339_v10 = vunpack.c.l.bf16 %v338_v3  ;;  %v340_v11 = vunpack.c.h.bf16 %v338_v3  ;;  %v347_v12 = vunpack.c.l.bf16 %v362_v8  ;;  %v348_v13 = vunpack.c.h.bf16 %v362_v8  ;;  %v58_v17 = vld [vmem:[%s536_s2 + $0x10] sm:$0xff]  ;;  %377 = vmatprep.mubr.msk.bf16.mxu0 %vm90_vm0, %v398_v14  ;;  %v56_v20 = vld [vmem:[%s536_s2] sm:$0xff]  ;;  %v57_v24 = vld [vmem:[%s536_s2 + $0x8] sm:$0xff] }
   0x6   :  { %v48_v15 = vmul.f32 %v351_v6, %v343_v4  ;;  %v49_v16 = vmul.f32 %v352_v7, %v344_v5  ;;  %72 = vperm.xlu0 %391, %v58_v17   ;;  %62 = vperm.xlu1 %392, %v56_v20  }
   0x7   :  { %v46_v18 = vmul.f32 %v347_v12, %v339_v10  ;;  %v47_v19 = vmul.f32 %v348_v13, %v340_v11 }
   0x8   :  { %v55_v21 = vpack.c.bf16 %v49_v16, %v48_v15 }
   0x9   :  { %v54_v23 = vpack.c.bf16 %v47_v19, %v46_v18 }
   0xa   :  { %373 = vmatprep.subr.bf16.mxu0 %v55_v21  ;;  %77 = vperm.xlu0 %391, %v59_v22  }
   0xb   :  { %374 = vmatpush3.bf16.msra.mxu0 %v55_v21 }
   0xc   :  { %14 = vsyncpa [#allocation4], 0  ;;  %375 = vmatprep.subr.bf16.mxu0 %v54_v23  ;;  %v156_v25 = vld [vmem:[%s538_s4] sm:$0xff]  ;;  %67 = vperm.xlu1 %392, %v57_v24   ;;  %v157_v27 = vld [vmem:[%s538_s4 + $0x8] sm:$0xff]  ;;  %vm281_vm1 = vcmask 130048   ;;  %vm312_vm2 = vcmask 122880  }
   0xd   :  { %v354_v26 = vld [vmem:[%s539_s5] sm:$0xff]   ;;  %v399_v28 = vld [vmem:[%s535_s1 + $0x8] sm:$0xff]   ;;  %v158_v31 = vld [vmem:[%s538_s4 + $0x10] sm:$0xff] }
   0xe   :  { %162 = vperm.xlu0 %391, %v156_v25   ;;  %v355_v29 = vunpack.c.l.bf16 %v354_v26  ;;  %v356_v30 = vunpack.c.h.bf16 %v354_v26  ;;  %v159_v32 = vld [vmem:[%s538_s4 + $0x18] sm:$0xff]  ;;  %v364_v33 = vld [vmem:[%s539_s5 + $0x8] sm:$0xff]   ;;  %v295_v37 = vld [vmem:[#allocation2] sm:$0x1]  ;;  %v301_v25 = vlaneseq }
   0xf   :  { %376 = vmatpush3.bf16.msra.mxu0 %v54_v23  ;;  %v359_v35 = vunpack.c.l.bf16 %v364_v33  ;;  %v360_v36 = vunpack.c.h.bf16 %v364_v33  ;;  %v400_v38 = vld [vmem:[%s537_s3] sm:$0xff]   ;;  %v401_v57 = vld [vmem:[%s537_s3 + $0x8] sm:$0xff]   ;;  %s429_s3 = smov [#allocation3]  }
  0x10   :  { %167 = vperm.xlu1 %392, %v157_v27   ;;  %v393_v34 = vpack.i.bf16 %v356_v30, %v355_v29  ;;  %385 = vmatprep.mubr.msk.bf16.mxu1 %vm90_vm0, %v400_v38  ;;  %s320_s6 = sshll.u32 %s429_s3, 4  ;;  %s321_s6 = int_to_ptr.vmem [resolvable:$true] %s320_s6 }
  0x11   :  { %s406_s10 = scalar_lea.vmem %s321_s6, 16  ;;  %s410_s11 = scalar_lea.vmem %s321_s6, 32 }
  0x12   :  { %378 = vmatmul.mubr.msk.bf16.vlgmr.msra.gmra.mxu0 %vm90_vm0, %v399_v28  ;;  %172 = vperm.xlu0 %391, %v158_v31   ;;  %v302_v28 = vshrl.u32 %v301_v25, 7  ;;  %p407_p0 = scmp.ne.s32.totalorder %s321_s6, %s406_s10  ;;  %p411_p1 = scmp.lt.s32.totalorder %s321_s6, %s321_s6 }
  0x13   :  { %p412_p2 = scmp.lt.s32.totalorder %s410_s11, %s406_s10 }
  0x14   :  { %177 = vperm.xlu1 %392, %v159_v32   ;;  %v303_v31 = vsub.s32 0, %v302_v28 }
  0x15   :  { %p413_p3 = por %p412_p2, %p411_p1 }
  0x16   :  { %394 = vperm.xlu0 %391, %v393_v34  }
  0x17   :  { %p414_p4 = pnand %p413_p3, %p407_p0 }
  0x18   :  { %269 = vperm.xlu1 %392, %v359_v35  }
  0x1a   :  { %274 = vperm.xlu0 %391, %v360_v36  }
  0x1c   :  { %298 = vperm.xlu1 %392, %v295_v37  }
  0x81   :  { %v73_v39 = vpop.permute.xlu0 %72  ;;  %v63_v40 = vpop.permute.xlu1 %62 }
  0x85   :  { %v78_v44 = vpop.permute.xlu0 %77 }
  0x87   :  { %v68_v48 = vpop.permute.xlu1 %67 }
  0x89   :  { %v163_v58 = vpop.permute.xlu0 %162 }
  0x8b   :  { %v168_v59 = vpop.permute.xlu1 %167 }
  0x8d   :  { %v173_v60 = vpop.permute.xlu0 %172 }
  0x8f   :  { %v178_v1 = vpop.permute.xlu1 %177 }
  0x91   :  { %v395_v5 = vpop.permute.xlu0 %394 }
  0x92   :  { %v396_v7 = vunpack.i.l.bf16 %v395_v5  ;;  %v397_v10 = vunpack.i.h.bf16 %v395_v5 }
  0x93   :  { %v270_v14 = vpop.permute.xlu1 %269 }
  0x95   :  { %v275_v17 = vpop.permute.xlu0 %274 }
  0x97   :  { %v299_v33 = vpop.permute.xlu1 %298 }
  0x98   :  { %v304_v35 = vrot.slane %v299_v33, %v303_v31 }
  0xd2   :  { %v379_v41 = vpop.f32.mrf.mxu0 }
  0xd3   :  { %v140_v43 = vadd.f32 %v379_v41, %v73_v39 }
  0xd4   :  { %v131_v42 = vpop.f32.mrf.mxu0 }
  0xd5   :  { %v132_v46 = vadd.f32 %v131_v42, %v63_v40  ;;  %v148_v50 = vmax.f32 %v140_v43, 0.0 }
  0xd6   :  { %v380_v45 = vpop.f32.mrf.mxu0 }
  0xd7   :  { %v143_v47 = vadd.f32 %v380_v45, %v78_v44  ;;  %v146_v53 = vmax.f32 %v132_v46, 0.0 }
  0xd8   :  { %v134_v49 = vpop.f32.mrf.mxu0 }
  0xd9   :  { %v149_v51 = vmax.f32 %v143_v47, 0.0  ;;  %v135_v52 = vadd.f32 %v134_v49, %v68_v48 }
  0xdb   :  { %v147_v54 = vmax.f32 %v135_v52, 0.0  ;;  %v155_v55 = vpack.c.bf16 %v149_v51, %v148_v50 }
  0xdd   :  { %v154_v56 = vpack.c.bf16 %v147_v54, %v146_v53  ;;  %381 = vmatprep.subr.bf16.mxu1 %v155_v55 }
  0xde   :  { %382 = vmatpush3.bf16.msra.mxu1 %v155_v55 }
  0xdf   :  { %383 = vmatprep.subr.bf16.mxu1 %v154_v56 }
  0xe2   :  { %384 = vmatpush3.bf16.msra.mxu1 %v154_v56 }
  0xe5   :  { %386 = vmatmul.mubr.msk.bf16.vlgmr.msra.gmra.mxu1 %vm90_vm0, %v401_v57 }
 0x1a5   :  { %v387_v61 = vpop.f32.mrf.mxu1 }
 0x1a6   :  { %v239_v63 = vadd.f32 %v387_v61, %v173_v60 }
 0x1a7   :  { %v230_v62 = vpop.f32.mrf.mxu1 }
 0x1a8   :  { %v231_v0 = vadd.f32 %v230_v62, %v163_v58  ;;  %v247_v8 = vmax.f32 %v239_v63, 0.0 }
 0x1a9   :  { %v388_v2 = vpop.f32.mrf.mxu1 }
 0x1aa   :  { %v245_v3 = vmax.f32 %v231_v0, 0.0  ;;  %v242_v4 = vadd.f32 %v388_v2, %v178_v1  ;;  %v279_v15 = vmul.f32 %v270_v14, %v247_v8 }
 0x1ab   :  { %v233_v6 = vpop.f32.mrf.mxu1 }
 0x1ac   :  { %v234_v9 = vadd.f32 %v233_v6, %v168_v59  ;;  %v277_v11 = vmul.f32 %v396_v7, %v245_v3  ;;  %v248_v12 = vmax.f32 %v242_v4, 0.0  ;;  %v285_v22 = vsel %vm281_vm1, %v279_v15, 0.0 }
 0x1ae   :  { %v246_v13 = vmax.f32 %v234_v9, 0.0  ;;  %v282_v18 = vsel %vm281_vm1, %v277_v11, 0.0  ;;  %v280_v19 = vmul.f32 %v275_v17, %v248_v12 }
 0x1b0   :  { %v278_v16 = vmul.f32 %v397_v10, %v246_v13  ;;  %v287_v24 = vsel %vm281_vm1, %v280_v19, 0.0 }
 0x1b2   :  { %v283_v20 = vsel %vm281_vm1, %v278_v16, 0.0 }
 0x1b3   :  { %v284_v21 = vadd.f32 %v283_v20, %v282_v18 }
 0x1b5   :  { %v286_v23 = vadd.f32 %v285_v22, %v284_v21 }
 0x1b7   :  { %v288_v26 = vadd.f32 %v287_v24, %v286_v23 }
 0x1b9   :  { %v289_v27 = vrot.slane %v288_v26, 4 }
 0x1bb   :  { %v290_v29 = vadd.f32 %v289_v27, %v288_v26 }
 0x1bd   :  { %v291_v30 = vrot.slane %v290_v29, 2 }
 0x1bf   :  { %v292_v32 = vadd.f32 %v291_v30, %v290_v29 }
 0x1c1   :  { %v293_v34 = vrot.slane %v292_v32, 1 }
 0x1c3   :  { %v294_v36 = vadd.f32 %v293_v34, %v292_v32 }
 0x1c5   :  { %v305_v37 = vadd.f32 %v304_v35, %v294_v36 }
 0x1c7   :  { %v336_v38 = vmul.f32 -1.442695, %v305_v37 }
 0x1c9   :  { %402 = vpow2.f32 %v336_v38 }
 0x1d6   :  { %v403_v39 = vpop.eup %402 }
 0x1d7   :  { %v309_v40 = vadd.f32 1.0, %v403_v39 }
 0x1d9   :  { %404 = vrcp.f32 %v309_v40 }
 0x1e6   :  { %v405_v41 = vpop.eup %404 }
 0x1e7   :  { %313 = vst.msk [vmem:[#allocation3] sm:$0x1] %vm312_vm2, %v405_v41 }
 0x1e8   :  { %417 = shalt.err (!%p414_p4)
}
 0x1e9   :  { %323 = dma.vmem_to_hbm [thread:$0]  %s321_s6, 16, %s541_s7, [#allocation4]  }
 0x1ea   :  { %426 = dma.done.wait [#allocation4], 16  }
 0x1eb   :  { %427 = vsyncadd [#allocation4], 4294967280 }
 0x1ec   :  { %327 = vsyncpa [#allocation4], 1 }

</bundles_post_ra>
